<compile_context>
chip_gen: v7x
topology: tpu7x:2x2x1
jax: 0.10.0
libtpu: 0.0.40
codegen_flags: <defaults>
</compile_context>

<pallas_src>
import functools

import jax
import jax.numpy as jnp
import numpy as np
from jax.experimental import pallas as pl
from jax.experimental.pallas import tpu as pltpu


def _conv3x3_kernel(x_ref, w_ref, b_ref, rc_ref, o_ref, stack_ref, *, H, W):
    """One batch image per grid step.

    x_ref:     (1, Cin, H*W)   row-flattened input image (no host padding)
    w_ref:     (Cout, 9*Cin)   folded conv weights, bf16, tap-major K
    b_ref:     (Cout, 1)       bias, f32
    rc_ref:    (2, H*W)        int32 row / col index of each flattened position
    o_ref:     (1, Cout, H*W)  lane-dense output block
    stack_ref: (9*Cin, H*W)    f32 VMEM scratch: folded matmul operand
    """
    L = H * W
    Cin = x_ref.shape[1]

    x = x_ref[0]                                          # (Cin, L)

    # Reflection-boundary masks: compares + one broadcast each (row/col indices
    # are precomputed host-side, so no vector int div/mod in the kernel).
    # Broadcast once and reuse to avoid per-tap re-broadcasts.
    row = rc_ref[0:1, :]
    col = rc_ref[1:2, :]
    edge_row = {-1: jnp.broadcast_to(row == 0, (Cin, L)),
                +1: jnp.broadcast_to(row == H - 1, (Cin, L))}
    edge_col = {-1: jnp.broadcast_to(col == 0, (Cin, L)),
                +1: jnp.broadcast_to(col == W - 1, (Cin, L))}

    # The 9 circularly shifted copies of the flattened image:
    #   shifted[(dr, dc)][:, p] == x[:, (p + dr*W + dc) mod L]
    # pltpu.roll -> XLU; wrapped-around lanes are never selected below.
    shifted = {}
    for dr in (-1, 0, 1):
        for dc in (-1, 0, 1):
            d = dr * W + dc
            shifted[(dr, dc)] = x if d == 0 else pltpu.roll(x, (-d) % L, 1)

    # Build the folded (9*Cin, L) operand.  Tap (kh, kw) reads padded coords
    # (r+kh, w+kw), i.e. source offset (dr, dc) = (kh-1, kw-1), except at the
    # image border where ReflectionPad2d flips the offset sign (padded index
    # -1 -> 1, H -> H-2), independently per axis.
    for kh in range(3):
        for kw in range(3):
            dr, dc = kh - 1, kw - 1
            tap = shifted[(dr, dc)]
            if dc != 0:
                tap = jnp.where(edge_col[dc], shifted[(dr, -dc)], tap)
            if dr != 0:
                flip = shifted[(-dr, dc)]
                if dc != 0:
                    flip = jnp.where(edge_col[dc], shifted[(-dr, -dc)], flip)
                tap = jnp.where(edge_row[dr], flip, tap)
            t = kh * 3 + kw
            stack_ref[pl.ds(t * Cin, Cin), :] = tap.astype(jnp.float32)

    # Single MXU matmul for all 9 taps: (Cout, 9*Cin) x (9*Cin, L),
    # bf16 operands, f32 accumulation; bias add in f32.
    acc = jnp.dot(w_ref[...], stack_ref[...].astype(jnp.bfloat16),
                  preferred_element_type=jnp.float32)
    o_ref[0] = (acc + b_ref[...]).astype(o_ref.dtype)


def conv3x3(x, weight, bias):
    """ReflectionPad2d(1) + Conv2d(Cin, Cout, 3) forward.  x: (B, Cin, H, W)."""
    B, Cin, H, W = x.shape
    Cout = weight.shape[0]
    assert H >= 2 and W >= 2, "ReflectionPad2d(1) requires H, W >= 2"
    L = H * W

    # Metadata-only layout prep: flatten spatial dims (no HBM copy of x).
    x_flat = x.reshape(B, Cin, L)

    # Fold the 3x3 taps into the contraction dim: row (kh*3+kw)*Cin + ci of
    # w_fold equals weight[:, ci, kh, kw]; bf16 for the full-rate MXU path.
    w_fold = jnp.transpose(weight, (0, 2, 3, 1)).reshape(Cout, 9 * Cin)
    w_fold = w_fold.astype(jnp.bfloat16)
    b2 = bias.reshape(Cout, 1).astype(jnp.float32)

    # Row/col index of every flattened position (tiny; loaded once, lets the
    # kernel form the reflection masks with compares only).
    p = jnp.arange(L, dtype=jnp.int32)
    rc = jnp.stack([p // W, p % W]).astype(jnp.int32)          # (2, L)

    kernel = functools.partial(_conv3x3_kernel, H=H, W=W)

    out = pl.pallas_call(
        kernel,
        out_shape=jax.ShapeDtypeStruct((B, Cout, L), x.dtype),
        grid_spec=pltpu.PrefetchScalarGridSpec(
            num_scalar_prefetch=0,
            grid=(B,),
            in_specs=[
                pl.BlockSpec((1, Cin, L), lambda b: (b, 0, 0)),
                pl.BlockSpec((Cout, 9 * Cin), lambda b: (0, 0)),
                pl.BlockSpec((Cout, 1), lambda b: (0, 0)),
                pl.BlockSpec((2, L), lambda b: (0, 0)),
            ],
            out_specs=pl.BlockSpec((1, Cout, L), lambda b: (b, 0, 0)),
            scratch_shapes=[pltpu.VMEM((9 * Cin, L), jnp.float32)],
        ),
        compiler_params=pltpu.CompilerParams(
            dimension_semantics=("parallel",)),
    )(x_flat, w_fold, b2, rc)

    # Metadata-only reshape back to NCHW (no lane padding / junk to strip).
    return out.reshape(B, Cout, H, W)


def reference_conv3x3(x, weight, bias):
    """Pure-JAX reference mirroring the PyTorch forward (f32 math)."""
    xp = jnp.pad(x, ((0, 0), (0, 0), (1, 1), (1, 1)), mode="reflect")
    out = jax.lax.conv_general_dilated(
        xp, weight, window_strides=(1, 1), padding="VALID",
        dimension_numbers=("NCHW", "OIHW", "NCHW"),
        precision=jax.lax.Precision.HIGHEST)
    return out + bias[None, :, None, None]


if __name__ == "__main__":
    B, Cin, Cout, H, W = 2, 4, 8, 16, 16

    key = jax.random.PRNGKey(0)
    kx, kw, kb = jax.random.split(key, 3)
    x = jax.random.normal(kx, (B, Cin, H, W), dtype=jnp.float32)
    weight = (0.1 * jax.random.normal(kw, (Cout, Cin, 3, 3))).astype(jnp.float32)
    bias = (0.1 * jax.random.normal(kb, (Cout,))).astype(jnp.float32)

    out = jax.block_until_ready(jax.jit(conv3x3)(x, weight, bias))

    # The kernel feeds the MXU bf16 operands with f32 accumulation; compare
    # against an f32 reference on the same bf16-rounded operands so the check
    # isolates kernel correctness (accumulation-order noise only).
    x_r = x.astype(jnp.bfloat16).astype(jnp.float32)
    w_r = weight.astype(jnp.bfloat16).astype(jnp.float32)
    ref = reference_conv3x3(x_r, w_r, bias)
    np.testing.assert_allclose(np.asarray(out), np.asarray(ref),
                               rtol=2e-3, atol=2e-3)

    print("KERNEL_OK")
</pallas_src>

<mosaic_0001>
module attributes {stable_mosaic.version = 11 : i64} {
  func.func @_conv3x3_kernel(%arg0: i32, %arg1: memref<1x4x256xf32, #tpu.memory_space<vmem>>, %arg2: memref<8x36xbf16, #tpu.memory_space<vmem>>, %arg3: memref<8x1xf32, #tpu.memory_space<vmem>>, %arg4: memref<2x256xi32, #tpu.memory_space<vmem>>, %arg5: memref<1x8x256xf32, #tpu.memory_space<vmem>>, %arg6: memref<36x256xf32, #tpu.memory_space<vmem>>) attributes {dimension_semantics = [#tpu.dimension_semantics<parallel>], iteration_bounds = array<i64: 2>, scalar_prefetch = 0 : i64, scratch_operands = 1 : i64, tpu.core_type = #tpu.core_type<tc>, window_params = [{transform_indices = @transform_0, window_bounds = array<i64: 1, 4, 256>}, {pipeline_mode = #tpu.pipeline_mode<synchronous>, transform_indices = @transform_1, window_bounds = array<i64: 8, 36>}, {pipeline_mode = #tpu.pipeline_mode<synchronous>, transform_indices = @transform_2, window_bounds = array<i64: 8, 1>}, {pipeline_mode = #tpu.pipeline_mode<synchronous>, transform_indices = @transform_3, window_bounds = array<i64: 2, 256>}, {transform_indices = @transform_4, window_bounds = array<i64: 1, 8, 256>}]} {
    %c0 = arith.constant 0 : index
    %c0_0 = arith.constant 0 : index
    %c0_1 = arith.constant 0 : index
    %0 = vector.load %arg1[%c0, %c0_0, %c0_1] : memref<1x4x256xf32, #tpu.memory_space<vmem>>, vector<1x4x256xf32>
    %1 = vector.shape_cast %0 : vector<1x4x256xf32> to vector<4x256xf32>
    %c0_2 = arith.constant 0 : index
    %c0_3 = arith.constant 0 : index
    %2 = vector.load %arg4[%c0_2, %c0_3] : memref<2x256xi32, #tpu.memory_space<vmem>>, vector<1x256xi32>
    %c1 = arith.constant 1 : index
    %c0_4 = arith.constant 0 : index
    %3 = vector.load %arg4[%c1, %c0_4] : memref<2x256xi32, #tpu.memory_space<vmem>>, vector<1x256xi32>
    %c0_i32 = arith.constant 0 : i32
    %4 = vector.broadcast %c0_i32 : i32 to vector<1x256xi32>
    %5 = arith.cmpi eq, %2, %4 : vector<1x256xi32>
    %6 = vector.shape_cast %5 : vector<1x256xi1> to vector<1x256xi1>
    %7 = vector.broadcast %6 : vector<1x256xi1> to vector<4x256xi1>
    %c15_i32 = arith.constant 15 : i32
    %8 = vector.broadcast %c15_i32 : i32 to vector<1x256xi32>
    %9 = arith.cmpi eq, %2, %8 : vector<1x256xi32>
    %10 = vector.shape_cast %9 : vector<1x256xi1> to vector<1x256xi1>
    %11 = vector.broadcast %10 : vector<1x256xi1> to vector<4x256xi1>
    %c0_i32_5 = arith.constant 0 : i32
    %12 = vector.broadcast %c0_i32_5 : i32 to vector<1x256xi32>
    %13 = arith.cmpi eq, %3, %12 : vector<1x256xi32>
    %14 = vector.shape_cast %13 : vector<1x256xi1> to vector<1x256xi1>
    %15 = vector.broadcast %14 : vector<1x256xi1> to vector<4x256xi1>
    %c15_i32_6 = arith.constant 15 : i32
    %16 = vector.broadcast %c15_i32_6 : i32 to vector<1x256xi32>
    %17 = arith.cmpi eq, %3, %16 : vector<1x256xi32>
    %18 = vector.shape_cast %17 : vector<1x256xi1> to vector<1x256xi1>
    %19 = vector.broadcast %18 : vector<1x256xi1> to vector<4x256xi1>
    %c17_i32 = arith.constant 17 : i32
    %20 = tpu.dynamic_rotate %1 by %c17_i32 dim 1 : vector<4x256xf32>, i32 -> vector<4x256xf32>
    %c16_i32 = arith.constant 16 : i32
    %21 = tpu.dynamic_rotate %1 by %c16_i32 dim 1 : vector<4x256xf32>, i32 -> vector<4x256xf32>
    %c15_i32_7 = arith.constant 15 : i32
    %22 = tpu.dynamic_rotate %1 by %c15_i32_7 dim 1 : vector<4x256xf32>, i32 -> vector<4x256xf32>
    %c1_i32 = arith.constant 1 : i32
    %23 = tpu.dynamic_rotate %1 by %c1_i32 dim 1 : vector<4x256xf32>, i32 -> vector<4x256xf32>
    %c255_i32 = arith.constant 255 : i32
    %24 = tpu.dynamic_rotate %1 by %c255_i32 dim 1 : vector<4x256xf32>, i32 -> vector<4x256xf32>
    %c241_i32 = arith.constant 241 : i32
    %25 = tpu.dynamic_rotate %1 by %c241_i32 dim 1 : vector<4x256xf32>, i32 -> vector<4x256xf32>
    %c240_i32 = arith.constant 240 : i32
    %26 = tpu.dynamic_rotate %1 by %c240_i32 dim 1 : vector<4x256xf32>, i32 -> vector<4x256xf32>
    %c239_i32 = arith.constant 239 : i32
    %27 = tpu.dynamic_rotate %1 by %c239_i32 dim 1 : vector<4x256xf32>, i32 -> vector<4x256xf32>
    %28 = arith.select %15, %22, %20 : vector<4x256xi1>, vector<4x256xf32>
    %29 = arith.select %15, %27, %25 : vector<4x256xi1>, vector<4x256xf32>
    %30 = arith.select %7, %29, %28 : vector<4x256xi1>, vector<4x256xf32>
    %c0_8 = arith.constant 0 : index
    %c0_9 = arith.constant 0 : index
    %31 = vector.load %arg6[%c0_8, %c0_9] : memref<36x256xf32, #tpu.memory_space<vmem>>, vector<4x256xf32>
    tpu.vector_store %arg6[%c0_8, %c0_9], %30 {strides = array<i32>} : memref<36x256xf32, #tpu.memory_space<vmem>>, vector<4x256xf32>,
    %32 = arith.select %7, %26, %21 : vector<4x256xi1>, vector<4x256xf32>
    %c4 = arith.constant 4 : index
    %c0_10 = arith.constant 0 : index
    %33 = vector.load %arg6[%c4, %c0_10] : memref<36x256xf32, #tpu.memory_space<vmem>>, vector<4x256xf32>
    tpu.vector_store %arg6[%c4, %c0_10], %32 {strides = array<i32>} : memref<36x256xf32, #tpu.memory_space<vmem>>, vector<4x256xf32>,
    %34 = arith.select %19, %20, %22 : vector<4x256xi1>, vector<4x256xf32>
    %35 = arith.select %19, %25, %27 : vector<4x256xi1>, vector<4x256xf32>
    %36 = arith.select %7, %35, %34 : vector<4x256xi1>, vector<4x256xf32>
    %c8 = arith.constant 8 : index
    %c0_11 = arith.constant 0 : index
    %37 = vector.load %arg6[%c8, %c0_11] : memref<36x256xf32, #tpu.memory_space<vmem>>, vector<4x256xf32>
    tpu.vector_store %arg6[%c8, %c0_11], %36 {strides = array<i32>} : memref<36x256xf32, #tpu.memory_space<vmem>>, vector<4x256xf32>,
    %38 = arith.select %15, %24, %23 : vector<4x256xi1>, vector<4x256xf32>
    %c12 = arith.constant 12 : index
    %c0_12 = arith.constant 0 : index
    %39 = vector.load %arg6[%c12, %c0_12] : memref<36x256xf32, #tpu.memory_space<vmem>>, vector<4x256xf32>
    tpu.vector_store %arg6[%c12, %c0_12], %38 {strides = array<i32>} : memref<36x256xf32, #tpu.memory_space<vmem>>, vector<4x256xf32>,
    %c16 = arith.constant 16 : index
    %c0_13 = arith.constant 0 : index
    %40 = vector.load %arg6[%c16, %c0_13] : memref<36x256xf32, #tpu.memory_space<vmem>>, vector<4x256xf32>
    tpu.vector_store %arg6[%c16, %c0_13], %1 {strides = array<i32>} : memref<36x256xf32, #tpu.memory_space<vmem>>, vector<4x256xf32>,
    %41 = arith.select %19, %23, %24 : vector<4x256xi1>, vector<4x256xf32>
    %c20 = arith.constant 20 : index
    %c0_14 = arith.constant 0 : index
    %42 = vector.load %arg6[%c20, %c0_14] : memref<36x256xf32, #tpu.memory_space<vmem>>, vector<4x256xf32>
    tpu.vector_store %arg6[%c20, %c0_14], %41 {strides = array<i32>} : memref<36x256xf32, #tpu.memory_space<vmem>>, vector<4x256xf32>,
    %43 = arith.select %15, %27, %25 : vector<4x256xi1>, vector<4x256xf32>
    %44 = arith.select %15, %22, %20 : vector<4x256xi1>, vector<4x256xf32>
    %45 = arith.select %11, %44, %43 : vector<4x256xi1>, vector<4x256xf32>
    %c24 = arith.constant 24 : index
    %c0_15 = arith.constant 0 : index
    %46 = vector.load %arg6[%c24, %c0_15] : memref<36x256xf32, #tpu.memory_space<vmem>>, vector<4x256xf32>
    tpu.vector_store %arg6[%c24, %c0_15], %45 {strides = array<i32>} : memref<36x256xf32, #tpu.memory_space<vmem>>, vector<4x256xf32>,
    %47 = arith.select %11, %21, %26 : vector<4x256xi1>, vector<4x256xf32>
    %c28 = arith.constant 28 : index
    %c0_16 = arith.constant 0 : index
    %48 = vector.load %arg6[%c28, %c0_16] : memref<36x256xf32, #tpu.memory_space<vmem>>, vector<4x256xf32>
    tpu.vector_store %arg6[%c28, %c0_16], %47 {strides = array<i32>} : memref<36x256xf32, #tpu.memory_space<vmem>>, vector<4x256xf32>,
    %49 = arith.select %19, %25, %27 : vector<4x256xi1>, vector<4x256xf32>
    %50 = arith.select %19, %20, %22 : vector<4x256xi1>, vector<4x256xf32>
    %51 = arith.select %11, %50, %49 : vector<4x256xi1>, vector<4x256xf32>
    %c32 = arith.constant 32 : index
    %c0_17 = arith.constant 0 : index
    %52 = vector.load %arg6[%c32, %c0_17] : memref<36x256xf32, #tpu.memory_space<vmem>>, vector<4x256xf32>
    tpu.vector_store %arg6[%c32, %c0_17], %51 {strides = array<i32>} : memref<36x256xf32, #tpu.memory_space<vmem>>, vector<4x256xf32>,
    %c0_18 = arith.constant 0 : index
    %c0_19 = arith.constant 0 : index
    %53 = vector.load %arg2[%c0_18, %c0_19] : memref<8x36xbf16, #tpu.memory_space<vmem>>, vector<8x36xbf16>
    %c0_20 = arith.constant 0 : index
    %c0_21 = arith.constant 0 : index
    %54 = vector.load %arg6[%c0_20, %c0_21] : memref<36x256xf32, #tpu.memory_space<vmem>>, vector<36x256xf32>
    %55 = arith.truncf %54 : vector<36x256xf32> to vector<36x256xbf16>
    %cst = arith.constant dense<0.000000e+00> : vector<8x256xf32>
    %56 = tpu.matmul %53, %55, %cst {dimension_numbers = #tpu.dot_dimension_numbers<[1], [0], [0], [1], [0, 0, 1, 1], [], []>} : vector<8x36xbf16>, vector<36x256xbf16>, vector<8x256xf32> -> vector<8x256xf32>
    %c0_22 = arith.constant 0 : index
    %c0_23 = arith.constant 0 : index
    %57 = vector.load %arg3[%c0_22, %c0_23] : memref<8x1xf32, #tpu.memory_space<vmem>>, vector<8x1xf32>
    %58 = vector.broadcast %57 : vector<8x1xf32> to vector<8x256xf32>
    %59 = arith.addf %56, %58 : vector<8x256xf32>
    %c0_24 = arith.constant 0 : index
    %c0_25 = arith.constant 0 : index
    %c0_26 = arith.constant 0 : index
    %60 = vector.load %arg5[%c0_24, %c0_25, %c0_26] : memref<1x8x256xf32, #tpu.memory_space<vmem>>, vector<1x8x256xf32>
    %61 = vector.shape_cast %60 : vector<1x8x256xf32> to vector<8x256xf32>
    %62 = vector.shape_cast %59 : vector<8x256xf32> to vector<1x8x256xf32>
    tpu.vector_store %arg5[%c0_24, %c0_25, %c0_26], %62 {strides = array<i32>} : memref<1x8x256xf32, #tpu.memory_space<vmem>>, vector<1x8x256xf32>,
    return
  }
  func.func @transform_0(%arg0: i32) -> (i32, i32, i32) {
    %c0_i32 = arith.constant 0 : i32
    %c0_i32_0 = arith.constant 0 : i32
    %c0_i32_1 = arith.constant 0 : i32
    return %arg0, %c0_i32, %c0_i32_0 : i32, i32, i32
  }
  func.func @transform_1(%arg0: i32) -> (i32, i32) {
    %c0_i32 = arith.constant 0 : i32
    %c0_i32_0 = arith.constant 0 : i32
    %c0_i32_1 = arith.constant 0 : i32
    return %c0_i32, %c0_i32_0 : i32, i32
  }
  func.func @transform_2(%arg0: i32) -> (i32, i32) {
    %c0_i32 = arith.constant 0 : i32
    %c0_i32_0 = arith.constant 0 : i32
    %c0_i32_1 = arith.constant 0 : i32
    return %c0_i32, %c0_i32_0 : i32, i32
  }
  func.func @transform_3(%arg0: i32) -> (i32, i32) {
    %c0_i32 = arith.constant 0 : i32
    %c0_i32_0 = arith.constant 0 : i32
    %c0_i32_1 = arith.constant 0 : i32
    return %c0_i32, %c0_i32_0 : i32, i32
  }
  func.func @transform_4(%arg0: i32) -> (i32, i32, i32) {
    %c0_i32 = arith.constant 0 : i32
    %c0_i32_0 = arith.constant 0 : i32
    %c0_i32_1 = arith.constant 0 : i32
    return %arg0, %c0_i32, %c0_i32_0 : i32, i32, i32
  }
}

</mosaic_0001>

<bundles_post_ra>
// kernel: conv3x3.1
= control target key start
LH: loop header
LB: loop body
LE: loop exit
PB: predicated region body
PF: predicated region fallthrough
CT: control target
= control target key end

     0   :  { %s587_s15 = smov 0   ;;  %s722_s0 = inlined_call_operand.vmem [shape: f32[2,4,256], index: 0, kind: input, shape index: {}]   ;;  %s723_s1 = inlined_call_operand.vmem [shape: bf16[8,36], index: 1, kind: input, shape index: {}]   ;;  %s724_s2 = inlined_call_operand.vmem [shape: f32[8,1], index: 2, kind: input, shape index: {}]   ;;  %s725_s3 = inlined_call_operand.vmem [shape: s32[2,256], index: 3, kind: input, shape index: {}]   ;;  %s726_s4 = inlined_call_operand.vmem [shape: f32[2,8,256], index: 4, kind: output, shape index: {}]  }
   0x1 LB: > { %s510_s16 = sadd.s32 4294967295, %s551_s15   ;;  %p514_p0 = scmp.ge.s32.totalorder %s551_s15, 1  ;;  %s551_s15 = sphi %s587_s15, %s14_s15  }
   0x2   : > { %p162_p1 = scmp.lt.s32.totalorder %s551_s15, 3 }
   0x4   : > { %p163_p2 = pnand %p514_p0, %p162_p1 }
   0x5   : > { %p188_p3 = scmp.lt.s32.totalorder (!%p163_p2), %s510_s16, 1  ;;  %v553_v0 = vmov (!%p163_p2), 0   ;;  %s554_s21 = smov (!%p163_p2), 1   ;;  %v395_v3 = vld [vmem:[%s724_s2] sm:$0xff] (!%p163_p2)  ;;  %v205_v4 = vlaneseq (!%p163_p2) }
   0x6   : > { %166 = sbr.rel (%p163_p2) target bundleno = 402 (0x192), region = 36  ;;  %444 = vmatprep.mubr.bf16.mxu0 (!%p163_p2), %v553_v0  ;;  %543 = vset.pattern.permute.xlu0 (!%p163_p2), %v553_v0  ;;  %s555_s22 = smov (!%p163_p2), 16   ;;  %v519_v5 = vld [vmem:[%s725_s3 + $0x1] ss:$2 sm:$0x3] (!%p163_p2) }
   0x7   : > { %s556_s23 = smov (!%p163_p2), 127   ;;  %s557_s24 = smov (!%p163_p2), 112   ;;  %v206_v6 = vshrl.u32 (!%p163_p2), %v205_v4, 7  ;;  %v200_v7 = vld [vmem:[%s725_s3] ss:$2 sm:$0x3] (!%p163_p2) }
   0x8   : > { %s558_s25 = smov (!%p163_p2), 17   ;;  %s559_s26 = smov (!%p163_p2), 15   ;;  %vm227_vm0 = vcmp.eq.s32.totalorder (!%p163_p2), %v519_v5, 0  ;;  %vm239_vm1 = vcmp.eq.s32.totalorder (!%p163_p2), %v519_v5, 15  ;;  %vm203_vm2 = vcmp.eq.s32.totalorder (!%p163_p2), %v200_v7, 0  ;;  %vm215_vm3 = vcmp.eq.s32.totalorder (!%p163_p2), %v200_v7, 15 }
   0x9   : > { %s560_s27 = smov (!%p163_p2), 113   ;;  %s561_s28 = smov (!%p163_p2), 111   ;;  %v207_v8 = vsub.s32 (!%p163_p2), 0, %v206_v6  ;;  %v211_v9 = vsub.s32 (!%p163_p2), 1, %v206_v6  ;;  %v228_v12 = vsel (!%p163_p2), %vm227_vm0, 1, %v553_v0  ;;  %v240_v13 = vsel (!%p163_p2), %vm239_vm1, 1, %v553_v0 }
   0xa   : > { %v204_v14 = vsel (!%p163_p2), %vm203_vm2, 1, %v553_v0  ;;  %v216_v15 = vsel (!%p163_p2), %vm215_vm3, 1, %v553_v0  ;;  %v610_v16 = vand.u32 (!%p163_p2), 127, %v205_v4 }
   0xb   : > { %v232_v17 = vrot.slane (!%p163_p2), %v228_v12, %v207_v8  ;;  %v236_v18 = vrot.slane (!%p163_p2), %v228_v12, %v211_v9  ;;  %v244_v19 = vrot.slane (!%p163_p2), %v240_v13, %v207_v8  ;;  %v248_v20 = vrot.slane (!%p163_p2), %v240_v13, %v211_v9 }
   0xc   : > { %v208_v23 = vrot.slane (!%p163_p2), %v204_v14, %v207_v8  ;;  %v212_v24 = vrot.slane (!%p163_p2), %v204_v14, %v211_v9  ;;  %v220_v25 = vrot.slane (!%p163_p2), %v216_v15, %v207_v8  ;;  %v224_v26 = vrot.slane (!%p163_p2), %v216_v15, %v211_v9 }
   0xd   : > { %s744_s16 = smov (!%p188_p3, %s510_s16), 1  ;;  %vm281_vm4 = vcmp.lt.s32.totalorder %v610_v16, 1  ;;  %vm288_vm5 = vcmp.lt.s32.totalorder %v610_v16, 127  ;;  %vm267_vm6 = vcmp.lt.s32.totalorder %v610_v16, 16  ;;  %vm302_vm7 = vcmp.lt.s32.totalorder %v610_v16, 112 }
   0xe   : > { %s524_s17 = sshll.u32 %s744_s16, 3  ;;  %vm616_vm8 = vcmp.eq.s32.totalorder %v232_v17, 1  ;;  %vm620_vm9 = vcmp.eq.s32.totalorder %v236_v18, 1  ;;  %vm624_vm10 = vcmp.eq.s32.totalorder %v244_v19, 1  ;;  %vm628_vm11 = vcmp.eq.s32.totalorder %v248_v20, 1  ;;  %s525_s11 = sshll.u32 %s744_s16, 4 }
   0xf   : > { %s192_s20 = scalar_lea.vmem %s722_s0, %s524_s17  ;;  %vm632_vm12 = vcmp.eq.s32.totalorder %v208_v23, 1  ;;  %vm636_vm13 = vcmp.eq.s32.totalorder %v212_v24, 1  ;;  %vm640_vm14 = vcmp.eq.s32.totalorder %v220_v25, 1  ;;  %vm644_vm15 = vcmp.eq.s32.totalorder %v224_v26, 1  ;;  %s197_s14 = scalar_lea.vmem %s726_s4, %s525_s11 }
  0x10   : > { %v199_v1 = vld [vmem:[%s192_s20] sm:$0xff]  ;;  %vm274_vm0 = vcmp.lt.s32.totalorder %v610_v16, 15  ;;  %vm260_vm1 = vcmp.lt.s32.totalorder %v610_v16, 17  ;;  %vm295_vm2 = vcmp.lt.s32.totalorder %v610_v16, 113  ;;  %vm309_vm3 = vcmp.lt.s32.totalorder %v610_v16, 111 }
  0x11   : > { %277 = vrot.lane.b32.xlu1 %v199_v1, %s554_s21  ;;  %348 = vst [vmem:[#allocation2 + $0x20] sm:$0xf] %v199_v1  ;;  %263 = vrot.lane.b32.xlu0 %v199_v1, %s555_s22  ;;  %v252_v2 = vcombine.high %v199_v1, %v199_v1 }
  0x13   : > { %349 = vst [vmem:[#allocation2 + $0x28] sm:$0xf] %v252_v2 }
  0x15   : > { %284 = vrot.lane.b32.xlu0 %v199_v1, %s556_s23  ;;  %279 = vrot.lane.b32.xlu1 %v252_v2, %s554_s21 }
  0x19   : > { %286 = vrot.lane.b32.xlu1 %v252_v2, %s556_s23  ;;  %265 = vrot.lane.b32.xlu0 %v252_v2, %s555_s22 }
  0x1d   : > { %300 = vrot.lane.b32.xlu1 %v252_v2, %s557_s24  ;;  %298 = vrot.lane.b32.xlu0 %v199_v1, %s557_s24 }
  0x21   : > { %256 = vrot.lane.b32.xlu1 %v252_v2, %s558_s25  ;;  %254 = vrot.lane.b32.xlu0 %v199_v1, %s558_s25 }
  0x25   : > { %272 = vrot.lane.b32.xlu1 %v252_v2, %s559_s26  ;;  %270 = vrot.lane.b32.xlu0 %v199_v1, %s559_s26 }
  0x29   : > { %293 = vrot.lane.b32.xlu1 %v252_v2, %s560_s27  ;;  %291 = vrot.lane.b32.xlu0 %v199_v1, %s560_s27 }
  0x2d   : > { %307 = vrot.lane.b32.xlu1 %v252_v2, %s561_s28  ;;  %305 = vrot.lane.b32.xlu0 %v199_v1, %s561_s28 }
  0x31   : > { %398 = vperm.xlu0 %543, %v395_v3  }
  0x83   : > { %v278_v10 = vpop.permute.xlu1 %277  ;;  %v264_v11 = vpop.permute.xlu0 %263 }
  0x87   : > { %v285_v21 = vpop.permute.xlu0 %284  ;;  %v280_v22 = vpop.permute.xlu1 %279 }
  0x88   : > { %v282_v37 = vsel %vm281_vm4, %v278_v10, %v280_v22  ;;  %v283_v38 = vsel %vm281_vm4, %v280_v22, %v278_v10  ;;  %vm405_vm4 = vcmask 1041408  }
  0x8b   : > { %v287_v31 = vpop.permute.xlu1 %286  ;;  %v266_v32 = vpop.permute.xlu0 %265 }
  0x8c   : > { %v289_v39 = vsel %vm288_vm5, %v285_v21, %v287_v31  ;;  %v290_v40 = vsel %vm288_vm5, %v287_v31, %v285_v21  ;;  %v268_v51 = vsel %vm267_vm6, %v264_v11, %v266_v32  ;;  %v269_v52 = vsel %vm267_vm6, %v266_v32, %v264_v11 }
  0x8d   : > { %v338_v41 = vsel %vm616_vm8, %v289_v39, %v283_v38  ;;  %v339_v42 = vsel %vm620_vm9, %v290_v40, %v282_v37  ;;  %v350_v43 = vsel %vm624_vm10, %v283_v38, %v289_v39  ;;  %v351_v44 = vsel %vm628_vm11, %v282_v37, %v290_v40 }
  0x8e   : > { %v342_v45 = vrot.slane %v338_v41, 4  ;;  %v343_v46 = vrot.slane %v339_v42, 4  ;;  %v354_v47 = vrot.slane %v350_v43, 4  ;;  %v355_v48 = vrot.slane %v351_v44, 4 }
  0x8f   : > { %v301_v49 = vpop.permute.xlu1 %300  ;;  %v299_v50 = vpop.permute.xlu0 %298  ;;  %vm401_vm5 = vcmask 293888  }
  0x90   : > { %346 = vst [vmem:[#allocation2 + $0x10] sm:$0xf0] %v342_v45  ;;  %347 = vst [vmem:[#allocation2 + $0x18] sm:$0xf0] %v343_v46  ;;  %v303_v53 = vsel %vm302_vm7, %v299_v50, %v301_v49  ;;  %v304_v54 = vsel %vm302_vm7, %v301_v49, %v299_v50 }
  0x91   : > { %358 = vst [vmem:[#allocation2 + $0x20] sm:$0xf0] %v354_v47  ;;  %359 = vst [vmem:[#allocation2 + $0x28] sm:$0xf0] %v355_v48  ;;  %v320_v55 = vsel %vm632_vm12, %v303_v53, %v269_v52  ;;  %v321_v56 = vsel %vm636_vm13, %v304_v54, %v268_v51  ;;  %v364_v57 = vsel %vm640_vm14, %v269_v52, %v303_v53  ;;  %v378_v48 = vld [vmem:[%s723_s1] sm:$0xf] }
  0x92   : > { %v365_v58 = vsel %vm644_vm15, %v268_v51, %v304_v54  ;;  %v324_v59 = vrot.slane %v320_v55, 4  ;;  %v325_v60 = vrot.slane %v321_v56, 4  ;;  %v368_v61 = vrot.slane %v364_v57, 4 }
  0x93   : > { %v369_v62 = vrot.slane %v365_v58, 4  ;;  %v257_v63 = vpop.permute.xlu1 %256  ;;  %v255_v0 = vpop.permute.xlu0 %254 }
  0x94   : > { %328 = vst [vmem:[#allocation2] sm:$0xf0] %v324_v59  ;;  %329 = vst [vmem:[#allocation2 + $0x8] sm:$0xf0] %v325_v60  ;;  %v261_v7 = vsel %vm260_vm1, %v255_v0, %v257_v63  ;;  %v262_v8 = vsel %vm260_vm1, %v257_v63, %v255_v0 }
  0x95   : > { %372 = vst [vmem:[#allocation2 + $0x30] sm:$0xf0] %v368_v61  ;;  %373 = vst [vmem:[#allocation2 + $0x38] sm:$0xf0] %v369_v62 }
  0x97   : > { %v273_v1 = vpop.permute.xlu1 %272  ;;  %v271_v2 = vpop.permute.xlu0 %270 }
  0x98   : > { %v275_v5 = vsel %vm274_vm0, %v271_v2, %v273_v1  ;;  %v276_v6 = vsel %vm274_vm0, %v273_v1, %v271_v2  ;;  %v384_v40 = vld [vmem:[#allocation2 + $0x28] sm:$0xff]  ;;  %v383_v43 = vld [vmem:[#allocation2 + $0x20] sm:$0xff] }
  0x99   : > { %v312_v9 = vsel %vm616_vm8, %v276_v6, %v262_v8  ;;  %v313_v10 = vsel %vm620_vm9, %v275_v5, %v261_v7  ;;  %v330_v11 = vsel %vm624_vm10, %v262_v8, %v276_v6  ;;  %v331_v12 = vsel %vm628_vm11, %v261_v7, %v275_v5 }
  0x9b   : > { %v294_v3 = vpop.permute.xlu1 %293  ;;  %v292_v4 = vpop.permute.xlu0 %291 }
  0x9c   : > { %v296_v15 = vsel %vm295_vm2, %v292_v4, %v294_v3  ;;  %v297_v17 = vsel %vm295_vm2, %v294_v3, %v292_v4 }
  0x9f   : > { %v308_v13 = vpop.permute.xlu1 %307  ;;  %v306_v14 = vpop.permute.xlu0 %305 }
  0xa0   : > { %v310_v18 = vsel %vm309_vm3, %v306_v14, %v308_v13  ;;  %v311_v16 = vsel %vm309_vm3, %v308_v13, %v306_v14 }
  0xa1   : > { %v314_v19 = vsel %vm616_vm8, %v310_v18, %v296_v15  ;;  %v315_v20 = vsel %vm620_vm9, %v311_v16, %v297_v17  ;;  %v332_v21 = vsel %vm624_vm10, %v296_v15, %v310_v18  ;;  %v333_v22 = vsel %vm628_vm11, %v297_v17, %v311_v16 }
  0xa2   : > { %v316_v23 = vsel %vm632_vm12, %v314_v19, %v312_v9  ;;  %v317_v24 = vsel %vm636_vm13, %v315_v20, %v313_v10  ;;  %v334_v25 = vsel %vm632_vm12, %v332_v21, %v330_v11  ;;  %v335_v26 = vsel %vm636_vm13, %v333_v22, %v331_v12 }
  0xa3   : > { %318 = vst [vmem:[#allocation2] sm:$0xf] %v316_v23  ;;  %319 = vst [vmem:[#allocation2 + $0x8] sm:$0xf] %v317_v24  ;;  %v360_v27 = vsel %vm640_vm14, %v312_v9, %v314_v19  ;;  %v361_v28 = vsel %vm644_vm15, %v313_v10, %v315_v20  ;;  %v374_v29 = vsel %vm640_vm14, %v330_v11, %v332_v21 }
  0xa4   : > { %336 = vst [vmem:[#allocation2 + $0x10] sm:$0xf] %v334_v25  ;;  %337 = vst [vmem:[#allocation2 + $0x18] sm:$0xf] %v335_v26  ;;  %v375_v30 = vsel %vm644_vm15, %v331_v12, %v333_v22 }
  0xa5   : > { %362 = vst [vmem:[#allocation2 + $0x30] sm:$0xf] %v360_v27  ;;  %363 = vst [vmem:[#allocation2 + $0x38] sm:$0xf] %v361_v28 }
  0xa6   : > { %376 = vst [vmem:[#allocation2 + $0x40] sm:$0xf] %v374_v29  ;;  %377 = vst [vmem:[#allocation2 + $0x48] sm:$0xf] %v375_v30 }
  0xaa   : > { %v380_v31 = vld [vmem:[#allocation2 + $0x8] sm:$0xff]  ;;  %v379_v33 = vld [vmem:[#allocation2] sm:$0xff] }
  0xab   : > { %v382_v32 = vld [vmem:[#allocation2 + $0x18] sm:$0xff]  ;;  %v381_v37 = vld [vmem:[#allocation2 + $0x10] sm:$0xff] }
  0xac   : > { %v390_v34 = vpack.c.bf16 %v382_v32, %v380_v31  ;;  %v386_v38 = vld [vmem:[#allocation2 + $0x38] sm:$0xff]  ;;  %v389_v39 = vpack.c.bf16 %v381_v37, %v379_v33  ;;  %v385_v42 = vld [vmem:[#allocation2 + $0x30] sm:$0xff] }
  0xad   : > { %v392_v41 = vpack.c.bf16 %v386_v38, %v384_v40  ;;  %v388_v35 = vld [vmem:[#allocation2 + $0x48] sm:$0xf]  ;;  %v387_v36 = vld [vmem:[#allocation2 + $0x40] sm:$0xf]  ;;  %v391_v44 = vpack.c.bf16 %v385_v42, %v383_v43 }
  0xae   : > { %412 = vmatprep.subr.bf16.mxu0 %v390_v34  ;;  %v394_v45 = vpack.c.bf16 %v388_v35, %v388_v35  ;;  %v393_v46 = vpack.c.bf16 %v387_v36, %v387_v36 }
  0xaf   : > { %413 = vmatpush1.bf16.msra.mxu0 %v389_v39 }
  0xb0   : > { %414 = vmatprep.subr.bf16.mxu0 %v392_v41  ;;  %v407_v47 = vsel %vm405_vm4, %v393_v46, 0  ;;  %v399_v49 = vpop.permute.xlu0 %398 }
  0xb3   : > { %415 = vmatpush1.bf16.msra.mxu0 %v391_v44 }
  0xb4   : > { %520 = vmatprep.subr.msk.bf16.mxu0 %vm405_vm4, %v394_v45 }
  0xb7   : > { %417 = vmatpush1.bf16.msra.mxu0 %v407_v47 }
  0xba   : > { %521 = vmatmul.mubr.msk.bf16.vlgmr.msra.gmra.mrb[0].mxu0 %vm401_vm5, %v378_v48 }
 0x18d   : > { %v446_v50 = vpop.f32.mrb[0].mxu0 }
 0x18e   : > { %v447_v51 = vadd.f32 %v446_v50, %v399_v49  ;;  %v448_v52 = vpop.f32.mrb[1].mxu0 }
 0x18f   : > { %v449_v53 = vadd.f32 %v448_v52, %v399_v49  ;;  %v450_v54 = vpop.f32.mrb[2].mxu0 }
 0x190   : > { %453 = vst [vmem:[%s197_s14] sm:$0xff] %v447_v51  ;;  %v451_v55 = vpop.f32.mrb[3].mxu0 }
 0x191   : > { %454 = vst [vmem:[%s197_s14 + $0x8] sm:$0xff] %v449_v53 }
 0x192 PF: > { %s14_s15 = sadd.s32 1, %s551_s15  }
 0x193   : > { %p11_p4 = scmp.ge.s32.totalorder %s14_s15, 4  }
 0x195   :  { %13 = sbr.rel (!%p11_p4) target bundleno = 1 (0x1), region = 67 }

</bundles_post_ra>
